<compile_context>
chip_gen: v6e
topology: v6e:2x2x1
jax: 0.10.0
libtpu: 0.0.40
codegen_flags: <defaults>
</compile_context>

<pallas_src>
import jax
import jax.numpy as jnp
from jax.experimental import pallas as pl
from jax.experimental.pallas import tpu as pltpu

C = 32              # channels (Cin == Cout for these blocks)
NUM_DOMAINS = 3     # number of LSBN domains
NUM_BLOCKS = 2      # (conv1x1 + LSBN + ReLU) blocks chained by the container
LANE = 128          # TPU lane width
L_TARGET = 16384    # max spatial (lane-axis) tile length
OVERHEAD_LANES = 2048   # per-grid-step fixed cost, in equivalent lane columns


def _choose_lane_tile(hw):
    """Pick a lane-tile length (multiple of 128, <= L_TARGET) minimizing
    padded-lanes-moved + per-step overhead."""
    hw_lanes = pl.cdiv(hw, LANE) * LANE
    max_l = min(L_TARGET, hw_lanes)
    best_l, best_cost = None, None
    for l in range(LANE, max_l + 1, LANE):
        steps = pl.cdiv(hw, l)
        cost = steps * l + steps * OVERHEAD_LANES
        if best_cost is None or cost < best_cost or (cost == best_cost and l > best_l):
            best_l, best_cost = l, cost
    return best_l


def _make_fused_kernel(num_blocks):
    """Fused chain: (conv1x1[gamma-folded] -> +beta -> ReLU) x num_blocks on one tile."""

    def kernel(dom_ref, x_ref, *refs):
        # dom_ref : SMEM (1,) int32 scalar prefetch (input2 / domain index;
        #           only consumed by the w_eff / beta index_maps)
        # x_ref   : (1, C, L) bf16 lane-dense spatial tile of one sample
        # refs    : (w0, b0, w1, b1, ..., o_ref)
        #   w_b   : (1, C, C)  bf16 domain-selected diag(gamma) @ W
        #   b_b   : (1, C, 1)  f32  domain-selected LSBN shift
        o_ref = refs[-1]
        x = x_ref[0]                                        # (C, L) bf16
        y = None
        for b in range(num_blocks):
            w = refs[2 * b][0]                              # (C, C) bf16
            bt = refs[2 * b + 1][0]                         # (C, 1) f32
            y = jnp.dot(w, x, preferred_element_type=jnp.float32)   # bf16 MXU -> f32
            y = jnp.maximum(y + bt, 0.0)                    # f32 VPU epilogue
            if b + 1 < num_blocks:
                x = y.astype(jnp.bfloat16)                  # re-quantize for next MXU op
        o_ref[0] = y.astype(o_ref.dtype)                    # final store in f32

    return kernel


def two_input_sequential(x_nchw, domain, params):
    """Forward of TwoInputSequential over (input1, input2).

    Returns (feature map NCHW, domain), mirroring the container's pass-through
    of input2.
    """
    N, Cc, H, W = x_nchw.shape
    num_blocks = len(params)
    hw = H * W

    # Lane-dense layout: stay in NCHW, spatial on the lane axis; pad spatial up to
    # a multiple of the chosen lane tile (safe: 1x1 conv / affine / ReLU never mix
    # lanes; padded lanes are discarded below).
    l_tile = _choose_lane_tile(hw)
    hw_pad = pl.cdiv(hw, l_tile) * l_tile
    x3 = x_nchw.reshape(N, Cc, hw).astype(jnp.bfloat16)     # bf16 HBM I/O
    if hw_pad != hw:
        x3 = jnp.pad(x3, ((0, 0), (0, 0), (0, hw_pad - hw)))

    # Clamp the prefetched domain so a bad input2 cannot index OOB parameters.
    dom = jnp.clip(domain.astype(jnp.int32), 0, NUM_DOMAINS - 1)

    grid = (N, hw_pad // l_tile)

    x_spec = pl.BlockSpec((1, Cc, l_tile), lambda n, l, d: (n, 0, l))
    out_spec = pl.BlockSpec((1, Cc, l_tile), lambda n, l, d: (n, 0, l))

    # Fold gamma into the conv weight per domain; constant/domain index_maps keep
    # parameters resident in VMEM across the whole grid.
    param_specs = []
    flat_params = []
    for (w, gamma, beta) in params:
        w_eff = (gamma * w[None]).astype(jnp.bfloat16)      # (D, C, C) = diag(gamma_d) @ W
        param_specs.append(pl.BlockSpec((1, Cc, Cc), lambda n, l, d: (d[0], 0, 0)))
        param_specs.append(pl.BlockSpec((1, Cc, 1), lambda n, l, d: (d[0], 0, 0)))
        flat_params += [w_eff, beta.astype(jnp.float32)]

    out = pl.pallas_call(
        _make_fused_kernel(num_blocks),
        out_shape=jax.ShapeDtypeStruct((N, Cc, hw_pad), x_nchw.dtype),
        grid_spec=pltpu.PrefetchScalarGridSpec(
            num_scalar_prefetch=1,              # domain index -> SMEM
            grid=grid,
            in_specs=[x_spec] + param_specs,
            out_specs=out_spec,
        ),
        compiler_params=pltpu.CompilerParams(
            dimension_semantics=("parallel", "parallel"),
            vmem_limit_bytes=32 * 1024 * 1024,   # v5e's 16 MiB default is the binding one
        ),
    )(dom, x3, *flat_params)

    out = out[:, :, :hw].reshape(N, Cc, H, W)
    return out, domain   # input2 forwarded unchanged, as in TwoInputSequential


def _reference(x_nchw, domain, params):
    """Pure-JAX reference with the same bf16 quantization points as the kernel."""
    N, Cc, H, W = x_nchw.shape
    d = jnp.clip(domain.astype(jnp.int32), 0, NUM_DOMAINS - 1)[0]
    x = x_nchw.reshape(N, Cc, H * W).astype(jnp.bfloat16)
    y = x.astype(jnp.float32)
    for (w, gamma, beta) in params:
        w_eff = (gamma[d] * w).astype(jnp.bfloat16)          # (C, C)
        y = jnp.einsum('oc,ncl->nol', w_eff.astype(jnp.float32), x.astype(jnp.float32))
        y = jnp.maximum(y + beta[d][None], 0.0)
        x = y.astype(jnp.bfloat16)
    return y.reshape(N, Cc, H, W), domain


def init_params(key):
    """Deterministic synthetic parameters for NUM_BLOCKS blocks."""
    params = []
    for _ in range(NUM_BLOCKS):
        key, k1, k2, k3 = jax.random.split(key, 4)
        w = 0.1 * jax.random.normal(k1, (C, C), jnp.float32)          # (Cout, Cin)
        gamma = 1.0 + 0.1 * jax.random.normal(k2, (NUM_DOMAINS, C, 1), jnp.float32)
        beta = 0.1 * jax.random.normal(k3, (NUM_DOMAINS, C, 1), jnp.float32)
        params.append((w, gamma, beta))
    return params


if __name__ == "__main__":
    key = jax.random.PRNGKey(0)
    kparams, kx1, kx2 = jax.random.split(key, 3)

    params = init_params(kparams)
    domain = jnp.array([1], dtype=jnp.int32)     # input2: domain index for LSBN

    # Two shapes: one lane-exact (HW = 256) and one exercising the spatial
    # remainder/padding path (HW = 81 -> padded to 128).
    for kx, (N, H, W) in ((kx1, (2, 16, 16)), (kx2, (2, 9, 9))):
        x = jax.random.normal(kx, (N, C, H, W), jnp.float32)

        out, dom_out = two_input_sequential(x, domain, params)
        out = jax.block_until_ready(out)

        ref_out, _ = _reference(x, domain, params)
        assert out.shape == (N, C, H, W)
        assert jnp.allclose(out, ref_out, atol=2e-3, rtol=2e-3)
        assert int(dom_out[0]) == int(domain[0])

    print("KERNEL_OK")
</pallas_src>

<mosaic_0001>
module attributes {stable_mosaic.version = 11 : i64} {
  func.func @kernel(%arg0: i32, %arg1: i32, %arg2: memref<1xi32, #tpu.memory_space<smem>>, %arg3: memref<1x32x256xbf16, #tpu.memory_space<vmem>>, %arg4: memref<1x32x32xbf16, #tpu.memory_space<vmem>>, %arg5: memref<1x32x1xf32, #tpu.memory_space<vmem>>, %arg6: memref<1x32x32xbf16, #tpu.memory_space<vmem>>, %arg7: memref<1x32x1xf32, #tpu.memory_space<vmem>>, %arg8: memref<1x32x256xf32, #tpu.memory_space<vmem>>) attributes {dimension_semantics = [#tpu.dimension_semantics<parallel>, #tpu.dimension_semantics<parallel>], iteration_bounds = array<i64: 2, 1>, scalar_prefetch = 1 : i64, scratch_operands = 0 : i64, tpu.core_type = #tpu.core_type<tc>, window_params = [{transform_indices = @transform_0, window_bounds = array<i64: 1, 32, 256>}, {transform_indices = @transform_1, window_bounds = array<i64: 1, 32, 32>}, {transform_indices = @transform_2, window_bounds = array<i64: 1, 32, 1>}, {transform_indices = @transform_3, window_bounds = array<i64: 1, 32, 32>}, {transform_indices = @transform_4, window_bounds = array<i64: 1, 32, 1>}, {transform_indices = @transform_5, window_bounds = array<i64: 1, 32, 256>}]} {
    %c0 = arith.constant 0 : index
    %c0_0 = arith.constant 0 : index
    %c0_1 = arith.constant 0 : index
    %0 = vector.load %arg3[%c0, %c0_0, %c0_1] : memref<1x32x256xbf16, #tpu.memory_space<vmem>>, vector<1x32x256xbf16>
    %1 = vector.shape_cast %0 : vector<1x32x256xbf16> to vector<32x256xbf16>
    %c0_2 = arith.constant 0 : index
    %c0_3 = arith.constant 0 : index
    %c0_4 = arith.constant 0 : index
    %2 = vector.load %arg4[%c0_2, %c0_3, %c0_4] : memref<1x32x32xbf16, #tpu.memory_space<vmem>>, vector<1x32x32xbf16>
    %3 = vector.shape_cast %2 : vector<1x32x32xbf16> to vector<32x32xbf16>
    %c0_5 = arith.constant 0 : index
    %c0_6 = arith.constant 0 : index
    %c0_7 = arith.constant 0 : index
    %4 = vector.load %arg5[%c0_5, %c0_6, %c0_7] : memref<1x32x1xf32, #tpu.memory_space<vmem>>, vector<1x32x1xf32>
    %5 = vector.shape_cast %4 : vector<1x32x1xf32> to vector<32x1xf32>
    %cst = arith.constant dense<0.000000e+00> : vector<32x256xf32>
    %6 = tpu.matmul %3, %1, %cst {dimension_numbers = #tpu.dot_dimension_numbers<[1], [0], [0], [1], [0, 0, 1, 1], [], []>} : vector<32x32xbf16>, vector<32x256xbf16>, vector<32x256xf32> -> vector<32x256xf32>
    %7 = vector.broadcast %5 : vector<32x1xf32> to vector<32x256xf32>
    %8 = arith.addf %6, %7 : vector<32x256xf32>
    %cst_8 = arith.constant 0.000000e+00 : f32
    %9 = vector.broadcast %cst_8 : f32 to vector<32x256xf32>
    %10 = arith.maximumf %8, %9 : vector<32x256xf32>
    %11 = arith.truncf %10 : vector<32x256xf32> to vector<32x256xbf16>
    %c0_9 = arith.constant 0 : index
    %c0_10 = arith.constant 0 : index
    %c0_11 = arith.constant 0 : index
    %12 = vector.load %arg6[%c0_9, %c0_10, %c0_11] : memref<1x32x32xbf16, #tpu.memory_space<vmem>>, vector<1x32x32xbf16>
    %13 = vector.shape_cast %12 : vector<1x32x32xbf16> to vector<32x32xbf16>
    %c0_12 = arith.constant 0 : index
    %c0_13 = arith.constant 0 : index
    %c0_14 = arith.constant 0 : index
    %14 = vector.load %arg7[%c0_12, %c0_13, %c0_14] : memref<1x32x1xf32, #tpu.memory_space<vmem>>, vector<1x32x1xf32>
    %15 = vector.shape_cast %14 : vector<1x32x1xf32> to vector<32x1xf32>
    %cst_15 = arith.constant dense<0.000000e+00> : vector<32x256xf32>
    %16 = tpu.matmul %13, %11, %cst_15 {dimension_numbers = #tpu.dot_dimension_numbers<[1], [0], [0], [1], [0, 0, 1, 1], [], []>} : vector<32x32xbf16>, vector<32x256xbf16>, vector<32x256xf32> -> vector<32x256xf32>
    %17 = vector.broadcast %15 : vector<32x1xf32> to vector<32x256xf32>
    %18 = arith.addf %16, %17 : vector<32x256xf32>
    %cst_16 = arith.constant 0.000000e+00 : f32
    %19 = vector.broadcast %cst_16 : f32 to vector<32x256xf32>
    %20 = arith.maximumf %18, %19 : vector<32x256xf32>
    %c0_17 = arith.constant 0 : index
    %c0_18 = arith.constant 0 : index
    %c0_19 = arith.constant 0 : index
    %21 = vector.load %arg8[%c0_17, %c0_18, %c0_19] : memref<1x32x256xf32, #tpu.memory_space<vmem>>, vector<1x32x256xf32>
    %22 = vector.shape_cast %21 : vector<1x32x256xf32> to vector<32x256xf32>
    %23 = vector.shape_cast %20 : vector<32x256xf32> to vector<1x32x256xf32>
    tpu.vector_store %arg8[%c0_17, %c0_18, %c0_19], %23 {strides = array<i32>} : memref<1x32x256xf32, #tpu.memory_space<vmem>>, vector<1x32x256xf32>,
    return
  }
  func.func @transform_0(%arg0: i32, %arg1: i32, %arg2: memref<1xi32, #tpu.memory_space<smem>>) -> (i32, i32, i32) {
    %c0_i32 = arith.constant 0 : i32
    %c0_i32_0 = arith.constant 0 : i32
    return %arg0, %c0_i32, %arg1 : i32, i32, i32
  }
  func.func @transform_1(%arg0: i32, %arg1: i32, %arg2: memref<1xi32, #tpu.memory_space<smem>>) -> (i32, i32, i32) {
    %c0 = arith.constant 0 : index
    %0 = memref.load %arg2[%c0] : memref<1xi32, #tpu.memory_space<smem>>
    %c0_i32 = arith.constant 0 : i32
    %c0_i32_0 = arith.constant 0 : i32
    %c0_i32_1 = arith.constant 0 : i32
    return %0, %c0_i32, %c0_i32_0 : i32, i32, i32
  }
  func.func @transform_2(%arg0: i32, %arg1: i32, %arg2: memref<1xi32, #tpu.memory_space<smem>>) -> (i32, i32, i32) {
    %c0 = arith.constant 0 : index
    %0 = memref.load %arg2[%c0] : memref<1xi32, #tpu.memory_space<smem>>
    %c0_i32 = arith.constant 0 : i32
    %c0_i32_0 = arith.constant 0 : i32
    %c0_i32_1 = arith.constant 0 : i32
    return %0, %c0_i32, %c0_i32_0 : i32, i32, i32
  }
  func.func @transform_3(%arg0: i32, %arg1: i32, %arg2: memref<1xi32, #tpu.memory_space<smem>>) -> (i32, i32, i32) {
    %c0 = arith.constant 0 : index
    %0 = memref.load %arg2[%c0] : memref<1xi32, #tpu.memory_space<smem>>
    %c0_i32 = arith.constant 0 : i32
    %c0_i32_0 = arith.constant 0 : i32
    %c0_i32_1 = arith.constant 0 : i32
    return %0, %c0_i32, %c0_i32_0 : i32, i32, i32
  }
  func.func @transform_4(%arg0: i32, %arg1: i32, %arg2: memref<1xi32, #tpu.memory_space<smem>>) -> (i32, i32, i32) {
    %c0 = arith.constant 0 : index
    %0 = memref.load %arg2[%c0] : memref<1xi32, #tpu.memory_space<smem>>
    %c0_i32 = arith.constant 0 : i32
    %c0_i32_0 = arith.constant 0 : i32
    %c0_i32_1 = arith.constant 0 : i32
    return %0, %c0_i32, %c0_i32_0 : i32, i32, i32
  }
  func.func @transform_5(%arg0: i32, %arg1: i32, %arg2: memref<1xi32, #tpu.memory_space<smem>>) -> (i32, i32, i32) {
    %c0_i32 = arith.constant 0 : i32
    %c0_i32_0 = arith.constant 0 : i32
    return %arg0, %c0_i32, %arg1 : i32, i32, i32
  }
}

</mosaic_0001>

<bundles_post_ra>
// kernel: tpu_custom_call.1
= control target key start
LH: loop header
LB: loop body
LE: loop exit
PB: predicated region body
PF: predicated region fallthrough
CT: control target
= control target key end

     0   :  { %s1155_s0 = inlined_call_operand.<no memory space> [shape: s32[1], index: 0, kind: input, shape index: {}]   ;;  %s1156_s1 = inlined_call_operand.vmem [shape: bf16[2,32,256], index: 1, kind: input, shape index: {}]   ;;  %s1157_s2 = inlined_call_operand.vmem [shape: bf16[3,32,32], index: 2, kind: input, shape index: {}]   ;;  %s1158_s3 = inlined_call_operand.vmem [shape: f32[3,32,1], index: 3, kind: input, shape index: {}]   ;;  %s1159_s4 = inlined_call_operand.vmem [shape: bf16[3,32,32], index: 4, kind: input, shape index: {}]   ;;  %s1160_s5 = inlined_call_operand.vmem [shape: f32[3,32,1], index: 5, kind: input, shape index: {}]   ;;  %s1161_s6 = inlined_call_operand.hbm [shape: f32[2,32,256], index: 6, kind: output, shape index: {}]  }
   0x1   :  { %11 = sst [smem:[#allocation3]] %s1155_s0 }
   0x2   :  { %12 = vsyncpa [#allocation5], 0 }
   0x3   :  { %14 = vsyncpa [#allocation5 + $0x1], 0  ;;  %s996_s23 = smov 0   ;;  %s998_s24 = smov 0  }
   0x4   :  { %s1000_s25 = smov 0   ;;  %s1002_s26 = smov 0  }
   0x5   :  { %s1004_s27 = smov 0   ;;  %s1006_s28 = smov 0  }
   0x6 LB: > { %s767_s0 = sadd.s32 4294967295, %s952_s28   ;;  %s768_s29 = sadd.s32 4294967294, %s952_s28   ;;  %s952_s28 = sphi %s1006_s28, %s20_s28   ;;  %s948_s27 = sphi %s1004_s27, %s1168_s27   ;;  %s944_s26 = sphi %s1002_s26, %s1167_s26   ;;  %s940_s25 = sphi %s1000_s25, %s1166_s25   ;;  %s936_s24 = sphi %s998_s24, %s1165_s24   ;;  %s932_s23 = sphi %s996_s23, %s1164_s23  }
   0x7   : > { %s32_s30 = sadd.s32 1, %s948_s27  ;;  %s181_s7 = sadd.s32 1, %s940_s25 }
   0x8   : > { %p34_p0 = scmp.ge.s32.totalorder %s32_s30, 2  ;;  %p191_p1 = scmp.ne.s32.totalorder %s940_s25, %s936_s24 }
   0x9   : > { %p192_p2 = scmp.eq.s32.totalorder %s767_s0, 1  ;;  %p197_p3 = scmp.ne.s32.totalorder %s936_s24, %s932_s23 }
   0xa   : > { %s1170_s30 = smov (%p34_p0, %s32_s30), 0  ;;  %p198_p5 = scmp.eq.s32.totalorder %s768_s29, 1 }
   0xb   : > { %p1036_p4 = por %p192_p2, %p191_p1  ;;  %s176_s9 = ssub.s32 %s948_s27, %s1170_s30 }
   0xc   : > { %p771_p6 = scmp.ge.s32.totalorder %s952_s28, 1  ;;  %p179_p7 = scmp.eq.s32.totalorder %s176_s9, 0 }
   0xd   : > { %p1043_p8 = por %p198_p5, %p197_p3  ;;  %p269_p9 = scmp.lt.s32.totalorder %s952_s28, 3 }
   0xe   : > { %s1049_s11 = scalar_select %p179_p7, %s940_s25, %s181_s7  }
   0xf   : > { %p270_p10 = pnand %p771_p6, %p269_p9 }
  0x10   : > { %p326_p11 = scmp.lt.s32.totalorder (!%p270_p10), %s944_s26, 1  ;;  %s335_s12 = sld [smem:[#allocation3]] (!%p270_p10) }
  0x11   : > { %273 = sbr.rel (%p270_p10) target bundleno = 481 (0x1e1), region = 40  ;;  %s805_s20 = sshll.u32 (!%p270_p10), %s944_s26, 10 }
  0x12   : > { %s1102_s29 = scalar_lea.hbm (!%p270_p10), %s1161_s6, %s805_s20  ;;  %s955_s9 = smov (!%p270_p10), [#allocation4]  }
  0x16   : > { %v954_v0 = vmov 0   ;;  %s327_s13 = scalar_select %p326_p11, %s944_s26, 1  ;;  %vm427_vm0 = vcmask 261120  }
  0x17   : > { %466 = vmatprep.mubr.bf16.mxu0 %v954_v0  ;;  %864 = vset.pattern.permute.xlu0 %v954_v0  ;;  %p336_p12 = scmp.lt.s32.totalorder %s335_s12, 2 }
  0x18   : > { %865 = vset.pattern.permute.xlu1 %v954_v0  ;;  %575 = vmatprep.mubr.bf16.mxu1 %v954_v0  ;;  %s800_s14 = sshll.u32 %s327_s13, 5 }
  0x19   : > { %s333_s17 = scalar_lea.vmem %s1156_s1, %s800_s14  ;;  %s1172_s12 = smov (!%p336_p12, %s335_s12), 2 }
  0x1a   : > { %v866_v1 = vld [vmem:[%s333_s17 + $0x14] ss:$8 sps:$4 sm:$0xff]   ;;  %v868_v2 = vld [vmem:[%s333_s17 + $0x10] ss:$8 sps:$4 sm:$0xff]   ;;  %v869_v3 = vld [vmem:[%s333_s17 + $0x4] ss:$8 sps:$4 sm:$0xff]  }
  0x1b   : > { %446 = vmatprep.subr.bf16.mxu0 %v866_v1  ;;  %v871_v4 = vld [vmem:[%s333_s17] ss:$8 sps:$4 sm:$0xff]   ;;  %s801_s18 = sshll.u32 %s1172_s12, 4  ;;  %s802_s19 = sshll.u32 %s1172_s12, 5 }
  0x1c   : > { %447 = vmatpush1.bf16.msra.mxu0 %v868_v2  ;;  %s340_s22 = scalar_lea.vmem %s1157_s2, %s801_s18  ;;  %s347_s7 = scalar_lea.vmem %s1158_s3, %s802_s19 }
  0x1d   : > { %448 = vmatprep.subr.bf16.mxu0 %v869_v3  ;;  %v872_v5 = vld [vmem:[%s340_s22] sm:$0xff]   ;;  %v375_v6 = vld [vmem:[%s347_s7 + $0x10] sm:$0xff]  ;;  %v376_v8 = vld [vmem:[%s347_s7 + $0x18] sm:$0xff]  ;;  %s361_s13 = scalar_lea.vmem %s1160_s5, %s802_s19  ;;  %s1079_s16 = scalar_lea.vmem %s1159_s4, %s801_s18 }
  0x1e   : > { %v373_v7 = vld [vmem:[%s347_s7] sm:$0xff]  ;;  %389 = vperm.xlu0 %864, %v375_v6   ;;  %v374_v9 = vld [vmem:[%s347_s7 + $0x8] sm:$0xff]  ;;  %v505_v13 = vld [vmem:[%s361_s13 + $0x10] sm:$0xff]  ;;  %s322_s17 = sand.u32 1, %s936_s24   ;;  %s880_s12 = sshll.u32 %s955_s9, 4  ;;  %s881_s12 = int_to_ptr.vmem [resolvable:$false] %s880_s12 }
  0x1f   : > { %379 = vperm.xlu1 %865, %v373_v7   ;;  %v873_v10 = vld [vmem:[%s340_s22 + $0x8] sm:$0xff]   ;;  %v503_v11 = vld [vmem:[%s361_s13] sm:$0xff]  ;;  %v506_v14 = vld [vmem:[%s361_s13 + $0x18] sm:$0xff]  ;;  %s772_s18 = sshll.u32 %s322_s17, 6  ;;  %s1110_s26 = scalar_lea.sflag [#allocation5], %s322_s17 }
  0x20   : > { %449 = vmatpush1.bf16.msra.mxu0 %v871_v4  ;;  %v504_v12 = vld [vmem:[%s361_s13 + $0x8] sm:$0xff]  ;;  %v874_v47 = vld [vmem:[%s1079_s16] sm:$0xff]   ;;  %s1089_s19 = scalar_lea.vmem [#allocation4], %s772_s18  ;;  %s882_s13 = scalar_lea.vmem %s881_s12, 2048 }
  0x21   : > { %v875_v48 = vld [vmem:[%s1079_s16 + $0x8] sm:$0xff]   ;;  %s628_s21 = sshll.u32 %s1089_s19, 4  ;;  %s1104_s21 = int_to_ptr.vmem [resolvable:$true] %s628_s21 }
  0x22   : > { %394 = vperm.xlu0 %864, %v376_v8   ;;  %s876_s7 = scalar_lea.vmem %s1104_s21, 1024  ;;  %p883_p2 = scmp.lt.s32.totalorder %s1104_s21, %s881_s12 }
  0x23   : > { %789 = vmatmul.mubr.msk.bf16.vlgmr.msra.gmra.mxu0 %vm427_vm0, %v872_v5  ;;  %384 = vperm.xlu1 %865, %v374_v9   ;;  %p877_p13 = scmp.ne.s32.totalorder %s1104_s21, %s876_s7  ;;  %p884_p3 = scmp.lt.s32.totalorder %s882_s13, %s876_s7 }
  0x24   : > { %476 = vmatprep.mubr.bf16.mxu0 %v954_v0 }
  0x25   : > { %p878_p0 = pnand %p877_p13, %p1036_p4  ;;  %p885_p5 = por %p884_p3, %p883_p2 }
  0x26   : > { %509 = vperm.xlu0 %864, %v503_v11  }
  0x27   : > { %514 = vperm.xlu1 %865, %v504_v12   ;;  %p879_p1 = pneg %p878_p0 }
  0x29   : > { %p886_p6 = pnand %p885_p5, %p879_p1 }
  0x2a   : > { %519 = vperm.xlu0 %864, %v505_v13  }
  0x2b   : > { %790 = vmatmul.mubr.msk.bf16.gmra.mxu0 %vm427_vm0, %v873_v10  ;;  %524 = vperm.xlu1 %865, %v506_v14  }
  0x99   : > { %v390_v18 = vpop.permute.xlu0 %389 }
  0x9a   : > { %v380_v19 = vpop.permute.xlu1 %379 }
  0x9d   : > { %v395_v23 = vpop.permute.xlu0 %394 }
  0x9e   : > { %v385_v24 = vpop.permute.xlu1 %384 }
  0xa1   : > { %v510_v49 = vpop.permute.xlu0 %509 }
  0xa2   : > { %v515_v55 = vpop.permute.xlu1 %514 }
  0xa5   : > { %v520_v62 = vpop.permute.xlu0 %519 }
  0xa6   : > { %v525_v5 = vpop.permute.xlu1 %524 }
  0xe3   : > { %v468_v15 = vpop.f32.mrf.mxu0 }
  0xe4   : > { %v469_v38 = vadd.f32 %v468_v15, %v380_v19 }
  0xe5   : > { %v470_v16 = vpop.f32.mrf.mxu0 }
  0xe6   : > { %v471_v31 = vadd.f32 %v470_v16, %v380_v19  ;;  %v487_v45 = vmax.f32 %v469_v38, 0.0 }
  0xe7   : > { %v472_v17 = vpop.f32.mrf.mxu0 }
  0xe8   : > { %v473_v33 = vadd.f32 %v472_v17, %v385_v24  ;;  %v488_v40 = vmax.f32 %v471_v31, 0.0 }
  0xe9   : > { %v474_v20 = vpop.f32.mrf.mxu0 }
  0xea   : > { %v475_v26 = vadd.f32 %v474_v20, %v385_v24  ;;  %v489_v42 = vmax.f32 %v473_v33, 0.0 }
  0xeb   : > { %v478_v21 = vpop.f32.mrf.mxu0 }
  0xec   : > { %v479_v29 = vadd.f32 %v478_v21, %v390_v18  ;;  %v490_v35 = vmax.f32 %v475_v26, 0.0  ;;  %v495_v46 = vpack.c.bf16 %v489_v42, %v487_v45 }
  0xed   : > { %v480_v22 = vpop.f32.mrf.mxu0 }
  0xee   : > { %v481_v27 = vadd.f32 %v480_v22, %v390_v18  ;;  %v491_v39 = vmax.f32 %v479_v29, 0.0  ;;  %v496_v44 = vpack.c.bf16 %v490_v35, %v488_v40 }
  0xef   : > { %v482_v25 = vpop.f32.mrf.mxu0 }
  0xf0   : > { %v483_v28 = vadd.f32 %v482_v25, %v395_v23  ;;  %v492_v36 = vmax.f32 %v481_v27, 0.0 }
  0xf1   : > { %v484_v30 = vpop.f32.mrf.mxu0 }
  0xf2   : > { %v485_v32 = vadd.f32 %v484_v30, %v395_v23  ;;  %v493_v34 = vmax.f32 %v483_v28, 0.0 }
  0xf4   : > { %v494_v37 = vmax.f32 %v485_v32, 0.0  ;;  %v497_v43 = vpack.c.bf16 %v493_v34, %v491_v39 }
  0xf6   : > { %v498_v41 = vpack.c.bf16 %v494_v37, %v492_v36 }
  0xf8   : > { %555 = vmatprep.subr.bf16.mxu1 %v498_v41 }
  0xf9   : > { %556 = vmatpush1.bf16.msra.mxu1 %v497_v43 }
  0xfa   : > { %557 = vmatprep.subr.bf16.mxu1 %v496_v44 }
  0xfd   : > { %558 = vmatpush1.bf16.msra.mxu1 %v495_v46 }
 0x100   : > { %793 = vmatmul.mubr.msk.bf16.vlgmr.msra.gmra.mxu1 %vm427_vm0, %v874_v47 }
 0x101   : > { %585 = vmatprep.mubr.bf16.mxu1 %v954_v0 }
 0x108   : > { %794 = vmatmul.mubr.msk.bf16.gmra.mxu1 %vm427_vm0, %v875_v48 }
 0x1c0   : > { %v577_v50 = vpop.f32.mrf.mxu1 }
 0x1c1   : > { %v578_v51 = vadd.f32 %v577_v50, %v510_v49 }
 0x1c2   : > { %v579_v52 = vpop.f32.mrf.mxu1 }
 0x1c3   : > { %v596_v53 = vmax.f32 %v578_v51, 0.0  ;;  %v580_v54 = vadd.f32 %v579_v52, %v510_v49 }
 0x1c4   : > { %v581_v56 = vpop.f32.mrf.mxu1 }
 0x1c5   : > { %604 = vst [vmem:[%s1089_s19] sm:$0xff] %v596_v53  ;;  %v597_v57 = vmax.f32 %v580_v54, 0.0  ;;  %v582_v58 = vadd.f32 %v581_v56, %v515_v55 }
 0x1c6   : > { %v583_v59 = vpop.f32.mrf.mxu1 }
 0x1c7   : > { %605 = vst [vmem:[%s1089_s19 + $0x8] sm:$0xff] %v597_v57  ;;  %v598_v60 = vmax.f32 %v582_v58, 0.0  ;;  %v584_v61 = vadd.f32 %v583_v59, %v515_v55 }
 0x1c8   : > { %v587_v63 = vpop.f32.mrf.mxu1 }
 0x1c9   : > { %606 = vst [vmem:[%s1089_s19 + $0x10] sm:$0xff] %v598_v60  ;;  %v599_v0 = vmax.f32 %v584_v61, 0.0  ;;  %v588_v1 = vadd.f32 %v587_v63, %v520_v62 }
 0x1ca   : > { %v589_v2 = vpop.f32.mrf.mxu1 }
 0x1cb   : > { %607 = vst [vmem:[%s1089_s19 + $0x18] sm:$0xff] %v599_v0  ;;  %v600_v3 = vmax.f32 %v588_v1, 0.0  ;;  %v590_v4 = vadd.f32 %v589_v2, %v520_v62 }
 0x1cc   : > { %v591_v6 = vpop.f32.mrf.mxu1 }
 0x1cd   : > { %608 = vst [vmem:[%s1089_s19 + $0x20] sm:$0xff] %v600_v3  ;;  %v601_v7 = vmax.f32 %v590_v4, 0.0  ;;  %v592_v8 = vadd.f32 %v591_v6, %v525_v5 }
 0x1ce   : > { %v593_v9 = vpop.f32.mrf.mxu1 }
 0x1cf   : > { %609 = vst [vmem:[%s1089_s19 + $0x28] sm:$0xff] %v601_v7  ;;  %v602_v10 = vmax.f32 %v592_v8, 0.0  ;;  %v594_v11 = vadd.f32 %v593_v9, %v525_v5 }
 0x1d1   : > { %610 = vst [vmem:[%s1089_s19 + $0x30] sm:$0xff] %v602_v10  ;;  %v603_v12 = vmax.f32 %v594_v11, 0.0 }
 0x1d3   : > { %611 = vst [vmem:[%s1089_s19 + $0x38] sm:$0xff] %v603_v12 }
 0x1d4   : > { %889 = shalt.err (!%p886_p6)
}
 0x1d5   : > { %s890_s14 = scalar_lea.hbm %s1102_s29, 1024  ;;  %s894_s17 = scalar_lea.hbm %s1161_s6, 2048 }
 0x1d6   : > { %p891_p7 = scmp.ne.s32.totalorder %s1102_s29, %s890_s14  ;;  %p895_p11 = scmp.lt.s32.totalorder %s1102_s29, %s1161_s6 }
 0x1d7   : > { %p896_p12 = scmp.lt.s32.totalorder %s894_s17, %s890_s14 }
 0x1d8   : > { %p892_p9 = pnand %p891_p7, %p1036_p4 }
 0x1d9   : > { %p897_p13 = por %p896_p12, %p895_p11 }
 0x1da   : > { %p893_p10 = pneg %p892_p9 }
 0x1dc   : > { %p898_p0 = pnand %p897_p13, %p893_p10 }
 0x1de   : > { %901 = shalt.err (!%p898_p0)
}
 0x1df   : > { %s956_s20 = smov 256   ;;  %s957_s22 = smov 16  }
 0x1e0   : > { %806 = dma.vmem_to_hbm [thread:$0]  (%p1036_p4), %s1104_s21, 1024, %s1102_s29, %s1110_s26, %s956_s20, %s956_s20, %s957_s22  }
 0x1e1 PF: > { %p812_p1 = scmp.ge.s32.totalorder %s952_s28, 2  ;;  %s643_s0 = sand.u32 1, %s932_s23  }
 0x1e2   : > { %s644_s7 = scalar_lea.sflag [#allocation5], %s643_s0 }
 0x1e3   : > { %p809_p2 = pnand %p812_p1, %p1043_p8 }
 0x1e5   : > { %p810_p3 = pneg %p809_p2 }
 0x1e7   : > { %927 = dma.done.wait (%p810_p3), %s644_s7, 1024  }
 0x1e8   : > { %929 = vsyncadd (%p810_p3), %s644_s7, 4294966272  ;;  %s20_s28 = sadd.s32 1, %s952_s28   ;;  %s1164_s23 = smov %s936_s24 }
 0x1e9   : > { %p17_p5 = scmp.ge.s32.totalorder %s20_s28, 4   ;;  %s1165_s24 = smov %s940_s25 }
 0x1ea   : > { %s1166_s25 = smov %s1049_s11  ;;  %s1167_s26 = smov %s948_s27 }
 0x1eb   : > { %s1168_s27 = smov %s1170_s30  ;;  %19 = sbr.rel (!%p17_p5) target bundleno = 6 (0x6), region = 87 }
 0x1f0   :  { %649 = vsyncpa [#allocation5], 1 }
 0x1f1   :  { %651 = vsyncpa [#allocation5 + $0x1], 1 }

</bundles_post_ra>
